<compile_context>
chip_gen: v7x
topology: tpu7x:2x2x1
jax: 0.10.0
libtpu: 0.0.40
codegen_flags: <defaults>
</compile_context>

<pallas_src>
import functools

import jax
import jax.numpy as jnp
from jax import lax
from jax.experimental import pallas as pl
from jax.experimental.pallas import tpu as pltpu


def _adaptive_windows(in_size, out_size):
    """PyTorch AdaptiveMaxPool2d windows: [floor(o*I/O), ceil((o+1)*I/O))."""
    return [
        ((o * in_size) // out_size, -(-((o + 1) * in_size) // out_size))
        for o in range(out_size)
    ]


def _adaptive_max_pool_flat(y, OH, OW):
    """Adaptive max-pool a (H, W) map to (OH, OW), returned flattened as (1, OH*OW).

    Two separable passes of statically-unrolled windowed max reductions.  The
    result is assembled row-by-row along the lane axis, matching the row-major
    flattening of the (N, C, OH, OW) features, so no reshape is required.
    """
    H, W = y.shape

    # Pass 1: reduce along W  ->  tmp (H, OW)
    if OW == W:
        tmp = y
    else:
        cols = []
        for ws, we in _adaptive_windows(W, OW):
            col = y[:, ws:we]
            if we - ws > 1:
                col = jnp.max(col, axis=1, keepdims=True)
            cols.append(col)
        tmp = jnp.concatenate(cols, axis=1)

    # Pass 2: reduce along H, emitting rows already laid out along lanes.
    rows = []
    for hs, he in _adaptive_windows(H, OH):
        row = tmp[hs:he, :]
        if he - hs > 1:
            row = jnp.max(row, axis=0, keepdims=True)
        rows.append(row)
    return jnp.concatenate(rows, axis=1) if len(rows) > 1 else rows[0]


def _make_fused_kernel(sizes, num_levels):
    """Kernel over refs: (y, x_0..x_{L-1}, o_0..o_{L-1}, pooled_scratch_0..L-1)."""

    def kernel(*refs):
        y_ref = refs[0]
        x_refs = refs[1:1 + num_levels]
        o_refs = refs[1 + num_levels:1 + 2 * num_levels]
        p_refs = refs[1 + 2 * num_levels:]

        # Pool the single-channel depth map once per batch element; the pooled
        # vectors stay resident in VMEM scratch across the channel-tile axis.
        @pl.when(pl.program_id(1) == 0)
        def _():
            y = y_ref[0, 0].astype(jnp.float32)          # (H, W)
            for (oh, ow), p_ref in zip(sizes, p_refs):
                p_ref[...] = _adaptive_max_pool_flat(y, oh, ow)

        # Lane-dense broadcast-add: x block is (1, C_tile, OH*OW),
        # pooled is (1, OH*OW) -> broadcasts over the channel (sublane) axis.
        for x_ref, o_ref, p_ref in zip(x_refs, o_refs, p_refs):
            o_ref[0] = (x_ref[0].astype(jnp.float32) + p_ref[...]).astype(o_ref.dtype)

    return kernel


def _pick_channel_tile(C, max_hw_flat, itemsize, budget_bytes=1 << 20):
    """Largest channel tile whose (tile, OH*OW) block stays under budget_bytes.

    Keeps double-buffered per-level in/out blocks well inside v7x's smaller
    VMEM at realistic mmdet sizes while remaining a single full-C tile for
    small problems (like the test shapes below).
    """
    if C * max_hw_flat * itemsize <= budget_bytes:
        return C
    best = 8 if C % 8 == 0 else C            # sublane rule when C is tiled
    for ct in range(8, C, 8):
        if C % ct == 0 and ct * max_hw_flat * itemsize <= budget_bytes:
            best = ct
    return best


@functools.partial(jax.jit, static_argnames=("sizes",))
def adaptive_maxpool_add_fused(y, features, sizes):
    """out_i = features[i] + AdaptiveMaxPool2d(sizes[i])(y), fused in one kernel."""
    N, Cy, H, W = y.shape
    assert Cy == 1, "depth map must have a single channel"
    num_levels = len(features)
    assert num_levels == len(sizes)

    # Flatten (OH, OW) -> OH*OW so every kernel load/store is lane-dense.
    # (Metadata-only reshape on contiguous NCHW arrays.)
    flat_feats = []
    for f, (oh, ow) in zip(features, sizes):
        n, c, fh, fw = f.shape
        assert (n, fh, fw) == (N, oh, ow)
        flat_feats.append(f.reshape(n, c, oh * ow))

    channels = [f.shape[1] for f in flat_feats]
    max_flat = max(oh * ow for (oh, ow) in sizes)
    if len(set(channels)) == 1:
        c_tile = _pick_channel_tile(channels[0], max_flat,
                                    jnp.dtype(features[0].dtype).itemsize)
        n_c_tiles = channels[0] // c_tile
    else:
        c_tile, n_c_tiles = None, 1          # mismatched C: whole-C blocks

    grid = (N, n_c_tiles)

    in_specs = [pl.BlockSpec((1, 1, H, W), lambda n, c: (n, 0, 0, 0))]
    out_specs, out_shapes, scratch_shapes = [], [], []
    for f, (oh, ow) in zip(flat_feats, sizes):
        ct = f.shape[1] if n_c_tiles == 1 else c_tile
        spec = pl.BlockSpec((1, ct, oh * ow), lambda n, c: (n, c, 0))
        in_specs.append(spec)
        out_specs.append(spec)
        out_shapes.append(jax.ShapeDtypeStruct(f.shape, f.dtype))
        scratch_shapes.append(pltpu.VMEM((1, oh * ow), jnp.float32))

    outs = pl.pallas_call(
        _make_fused_kernel(tuple(sizes), num_levels),
        out_shape=tuple(out_shapes),
        grid=grid,
        in_specs=in_specs,
        out_specs=tuple(out_specs),
        scratch_shapes=scratch_shapes,
        compiler_params=pltpu.CompilerParams(
            # Batch axis can be sharded across TensorCores; the channel-tile
            # axis is 'arbitrary' since the pooled scratch written at c == 0 is
            # reused by later channel tiles.
            dimension_semantics=("parallel", "arbitrary")),
    )(y, *flat_feats)

    # Free metadata reshape back to NCHW.
    return tuple(o.reshape(f.shape) for o, f in zip(outs, features))


class AdaptiveMaxPoolPallas:
    """Pallas equivalent of the PyTorch AdaptiveMaxPool fusion module."""

    def __init__(self, size_list):
        self.size_list = tuple(tuple(s) for s in size_list)

    def __call__(self, x, y):
        depth = lax.stop_gradient(y)         # y.detach()
        return adaptive_maxpool_add_fused(depth, tuple(x), self.size_list)


def _ref_adaptive_max_pool(y, oh, ow):
    """Pure-JAX reference with PyTorch AdaptiveMaxPool2d window semantics."""
    N, C, H, W = y.shape
    rows = []
    for i in range(oh):
        hs, he = (i * H) // oh, -(-((i + 1) * H) // oh)
        cols = []
        for j in range(ow):
            ws, we = (j * W) // ow, -(-((j + 1) * W) // ow)
            cols.append(jnp.max(y[:, :, hs:he, ws:we], axis=(2, 3)))
        rows.append(jnp.stack(cols, axis=-1))
    return jnp.stack(rows, axis=-2)


if __name__ == "__main__":
    key = jax.random.PRNGKey(0)
    k_y, *k_feats = jax.random.split(key, 5)

    N, C = 2, 4
    H = W = 16
    # Includes an identity level (16,16) and a non-divisible level (6,6).
    size_list = [(16, 16), (8, 8), (6, 6), (4, 4)]

    y = jax.random.normal(k_y, (N, 1, H, W), dtype=jnp.float32)
    x = tuple(
        jax.random.normal(k, (N, C, oh, ow), dtype=jnp.float32)
        for k, (oh, ow) in zip(k_feats, size_list)
    )

    model = AdaptiveMaxPoolPallas(size_list)
    outs = model(x, y)
    outs = jax.block_until_ready(outs)

    # Correctness check against a pure-JAX reference (PyTorch semantics).
    for feat, (oh, ow), out in zip(x, size_list, outs):
        pooled_ref = _ref_adaptive_max_pool(y, oh, ow)
        expected = feat + pooled_ref          # broadcast over channel dim
        assert out.shape == feat.shape and out.dtype == feat.dtype
        assert jnp.allclose(out, expected, atol=1e-6, rtol=1e-6), (oh, ow)

    print("KERNEL_OK")
</pallas_src>

<mosaic_0001>
module attributes {stable_mosaic.version = 11 : i64} {
  func.func @kernel(%arg0: i32, %arg1: i32, %arg2: memref<1x1x16x16xf32, #tpu.memory_space<vmem>>, %arg3: memref<1x4x256xf32, #tpu.memory_space<vmem>>, %arg4: memref<1x4x64xf32, #tpu.memory_space<vmem>>, %arg5: memref<1x4x36xf32, #tpu.memory_space<vmem>>, %arg6: memref<1x4x16xf32, #tpu.memory_space<vmem>>, %arg7: memref<1x4x256xf32, #tpu.memory_space<vmem>>, %arg8: memref<1x4x64xf32, #tpu.memory_space<vmem>>, %arg9: memref<1x4x36xf32, #tpu.memory_space<vmem>>, %arg10: memref<1x4x16xf32, #tpu.memory_space<vmem>>, %arg11: memref<1x256xf32, #tpu.memory_space<vmem>>, %arg12: memref<1x64xf32, #tpu.memory_space<vmem>>, %arg13: memref<1x36xf32, #tpu.memory_space<vmem>>, %arg14: memref<1x16xf32, #tpu.memory_space<vmem>>) attributes {dimension_semantics = [#tpu.dimension_semantics<parallel>, #tpu.dimension_semantics<arbitrary>], iteration_bounds = array<i64: 2, 1>, scalar_prefetch = 0 : i64, scratch_operands = 4 : i64, tpu.core_type = #tpu.core_type<tc>, window_params = [{transform_indices = @transform_0, window_bounds = array<i64: 1, 1, 16, 16>}, {transform_indices = @transform_1, window_bounds = array<i64: 1, 4, 256>}, {transform_indices = @transform_2, window_bounds = array<i64: 1, 4, 64>}, {transform_indices = @transform_3, window_bounds = array<i64: 1, 4, 36>}, {transform_indices = @transform_4, window_bounds = array<i64: 1, 4, 16>}, {transform_indices = @transform_5, window_bounds = array<i64: 1, 4, 256>}, {transform_indices = @transform_6, window_bounds = array<i64: 1, 4, 64>}, {transform_indices = @transform_7, window_bounds = array<i64: 1, 4, 36>}, {transform_indices = @transform_8, window_bounds = array<i64: 1, 4, 16>}]} {
    %c0_i32 = arith.constant 0 : i32
    %0 = arith.cmpi eq, %arg1, %c0_i32 : i32
    %1 = arith.extui %0 : i1 to i32
    %c0_i32_0 = arith.constant 0 : i32
    %2 = arith.cmpi ne, %1, %c0_i32_0 : i32
    scf.if %2 {
      %c0_32 = arith.constant 0 : index
      %c0_33 = arith.constant 0 : index
      %c0_34 = arith.constant 0 : index
      %c0_35 = arith.constant 0 : index
      %35 = vector.load %arg2[%c0_32, %c0_33, %c0_34, %c0_35] : memref<1x1x16x16xf32, #tpu.memory_space<vmem>>, vector<1x1x16x16xf32>
      %36 = vector.shape_cast %35 : vector<1x1x16x16xf32> to vector<16x16xf32>
      %37 = vector.extract_strided_slice %36 {offsets = [0, 0], sizes = [1, 16], strides = [1, 1]} : vector<16x16xf32> to vector<1x16xf32>
      %38 = vector.extract_strided_slice %36 {offsets = [1, 0], sizes = [1, 16], strides = [1, 1]} : vector<16x16xf32> to vector<1x16xf32>
      %39 = vector.extract_strided_slice %36 {offsets = [2, 0], sizes = [1, 16], strides = [1, 1]} : vector<16x16xf32> to vector<1x16xf32>
      %40 = vector.extract_strided_slice %36 {offsets = [3, 0], sizes = [1, 16], strides = [1, 1]} : vector<16x16xf32> to vector<1x16xf32>
      %41 = vector.extract_strided_slice %36 {offsets = [4, 0], sizes = [1, 16], strides = [1, 1]} : vector<16x16xf32> to vector<1x16xf32>
      %42 = vector.extract_strided_slice %36 {offsets = [5, 0], sizes = [1, 16], strides = [1, 1]} : vector<16x16xf32> to vector<1x16xf32>
      %43 = vector.extract_strided_slice %36 {offsets = [6, 0], sizes = [1, 16], strides = [1, 1]} : vector<16x16xf32> to vector<1x16xf32>
      %44 = vector.extract_strided_slice %36 {offsets = [7, 0], sizes = [1, 16], strides = [1, 1]} : vector<16x16xf32> to vector<1x16xf32>
      %45 = vector.extract_strided_slice %36 {offsets = [8, 0], sizes = [1, 16], strides = [1, 1]} : vector<16x16xf32> to vector<1x16xf32>
      %46 = vector.extract_strided_slice %36 {offsets = [9, 0], sizes = [1, 16], strides = [1, 1]} : vector<16x16xf32> to vector<1x16xf32>
      %47 = vector.extract_strided_slice %36 {offsets = [10, 0], sizes = [1, 16], strides = [1, 1]} : vector<16x16xf32> to vector<1x16xf32>
      %48 = vector.extract_strided_slice %36 {offsets = [11, 0], sizes = [1, 16], strides = [1, 1]} : vector<16x16xf32> to vector<1x16xf32>
      %49 = vector.extract_strided_slice %36 {offsets = [12, 0], sizes = [1, 16], strides = [1, 1]} : vector<16x16xf32> to vector<1x16xf32>
      %50 = vector.extract_strided_slice %36 {offsets = [13, 0], sizes = [1, 16], strides = [1, 1]} : vector<16x16xf32> to vector<1x16xf32>
      %51 = vector.extract_strided_slice %36 {offsets = [14, 0], sizes = [1, 16], strides = [1, 1]} : vector<16x16xf32> to vector<1x16xf32>
      %52 = vector.extract_strided_slice %36 {offsets = [15, 0], sizes = [1, 16], strides = [1, 1]} : vector<16x16xf32> to vector<1x16xf32>
      %53 = tpu.concatenate %37, %38, %39, %40, %41, %42, %43, %44, %45, %46, %47, %48, %49, %50, %51, %52 in 1 : vector<1x16xf32>, vector<1x16xf32>, vector<1x16xf32>, vector<1x16xf32>, vector<1x16xf32>, vector<1x16xf32>, vector<1x16xf32>, vector<1x16xf32>, vector<1x16xf32>, vector<1x16xf32>, vector<1x16xf32>, vector<1x16xf32>, vector<1x16xf32>, vector<1x16xf32>, vector<1x16xf32>, vector<1x16xf32> -> vector<1x256xf32>
      %c0_36 = arith.constant 0 : index
      %c0_37 = arith.constant 0 : index
      %54 = vector.load %arg11[%c0_36, %c0_37] : memref<1x256xf32, #tpu.memory_space<vmem>>, vector<1x256xf32>
      tpu.vector_store %arg11[%c0_36, %c0_37], %53 {strides = array<i32>} : memref<1x256xf32, #tpu.memory_space<vmem>>, vector<1x256xf32>,
      %55 = vector.extract_strided_slice %36 {offsets = [0, 0], sizes = [16, 2], strides = [1, 1]} : vector<16x16xf32> to vector<16x2xf32>
      %cst = arith.constant dense<0xFF800000> : vector<16xf32>
      %56 = vector.multi_reduction <maximumf>, %55, %cst [1] : vector<16x2xf32> to vector<16xf32>
      %57 = vector.shape_cast %56 : vector<16xf32> to vector<16x1xf32>
      %58 = vector.extract_strided_slice %36 {offsets = [0, 2], sizes = [16, 2], strides = [1, 1]} : vector<16x16xf32> to vector<16x2xf32>
      %cst_38 = arith.constant dense<0xFF800000> : vector<16xf32>
      %59 = vector.multi_reduction <maximumf>, %58, %cst_38 [1] : vector<16x2xf32> to vector<16xf32>
      %60 = vector.shape_cast %59 : vector<16xf32> to vector<16x1xf32>
      %61 = vector.extract_strided_slice %36 {offsets = [0, 4], sizes = [16, 2], strides = [1, 1]} : vector<16x16xf32> to vector<16x2xf32>
      %cst_39 = arith.constant dense<0xFF800000> : vector<16xf32>
      %62 = vector.multi_reduction <maximumf>, %61, %cst_39 [1] : vector<16x2xf32> to vector<16xf32>
      %63 = vector.shape_cast %62 : vector<16xf32> to vector<16x1xf32>
      %64 = vector.extract_strided_slice %36 {offsets = [0, 6], sizes = [16, 2], strides = [1, 1]} : vector<16x16xf32> to vector<16x2xf32>
      %cst_40 = arith.constant dense<0xFF800000> : vector<16xf32>
      %65 = vector.multi_reduction <maximumf>, %64, %cst_40 [1] : vector<16x2xf32> to vector<16xf32>
      %66 = vector.shape_cast %65 : vector<16xf32> to vector<16x1xf32>
      %67 = vector.extract_strided_slice %36 {offsets = [0, 8], sizes = [16, 2], strides = [1, 1]} : vector<16x16xf32> to vector<16x2xf32>
      %cst_41 = arith.constant dense<0xFF800000> : vector<16xf32>
      %68 = vector.multi_reduction <maximumf>, %67, %cst_41 [1] : vector<16x2xf32> to vector<16xf32>
      %69 = vector.shape_cast %68 : vector<16xf32> to vector<16x1xf32>
      %70 = vector.extract_strided_slice %36 {offsets = [0, 10], sizes = [16, 2], strides = [1, 1]} : vector<16x16xf32> to vector<16x2xf32>
      %cst_42 = arith.constant dense<0xFF800000> : vector<16xf32>
      %71 = vector.multi_reduction <maximumf>, %70, %cst_42 [1] : vector<16x2xf32> to vector<16xf32>
      %72 = vector.shape_cast %71 : vector<16xf32> to vector<16x1xf32>
      %73 = vector.extract_strided_slice %36 {offsets = [0, 12], sizes = [16, 2], strides = [1, 1]} : vector<16x16xf32> to vector<16x2xf32>
      %cst_43 = arith.constant dense<0xFF800000> : vector<16xf32>
      %74 = vector.multi_reduction <maximumf>, %73, %cst_43 [1] : vector<16x2xf32> to vector<16xf32>
      %75 = vector.shape_cast %74 : vector<16xf32> to vector<16x1xf32>
      %76 = vector.extract_strided_slice %36 {offsets = [0, 14], sizes = [16, 2], strides = [1, 1]} : vector<16x16xf32> to vector<16x2xf32>
      %cst_44 = arith.constant dense<0xFF800000> : vector<16xf32>
      %77 = vector.multi_reduction <maximumf>, %76, %cst_44 [1] : vector<16x2xf32> to vector<16xf32>
      %78 = vector.shape_cast %77 : vector<16xf32> to vector<16x1xf32>
      %79 = tpu.concatenate %57, %60, %63, %66, %69, %72, %75, %78 in 1 : vector<16x1xf32>, vector<16x1xf32>, vector<16x1xf32>, vector<16x1xf32>, vector<16x1xf32>, vector<16x1xf32>, vector<16x1xf32>, vector<16x1xf32> -> vector<16x8xf32>
      %80 = vector.extract_strided_slice %79 {offsets = [0, 0], sizes = [2, 8], strides = [1, 1]} : vector<16x8xf32> to vector<2x8xf32>
      %cst_45 = arith.constant dense<0xFF800000> : vector<8xf32>
      %81 = vector.multi_reduction <maximumf>, %80, %cst_45 [0] : vector<2x8xf32> to vector<8xf32>
      %82 = vector.shape_cast %81 : vector<8xf32> to vector<1x8xf32>
      %83 = vector.extract_strided_slice %79 {offsets = [2, 0], sizes = [2, 8], strides = [1, 1]} : vector<16x8xf32> to vector<2x8xf32>
      %cst_46 = arith.constant dense<0xFF800000> : vector<8xf32>
      %84 = vector.multi_reduction <maximumf>, %83, %cst_46 [0] : vector<2x8xf32> to vector<8xf32>
      %85 = vector.shape_cast %84 : vector<8xf32> to vector<1x8xf32>
      %86 = vector.extract_strided_slice %79 {offsets = [4, 0], sizes = [2, 8], strides = [1, 1]} : vector<16x8xf32> to vector<2x8xf32>
      %cst_47 = arith.constant dense<0xFF800000> : vector<8xf32>
      %87 = vector.multi_reduction <maximumf>, %86, %cst_47 [0] : vector<2x8xf32> to vector<8xf32>
      %88 = vector.shape_cast %87 : vector<8xf32> to vector<1x8xf32>
      %89 = vector.extract_strided_slice %79 {offsets = [6, 0], sizes = [2, 8], strides = [1, 1]} : vector<16x8xf32> to vector<2x8xf32>
      %cst_48 = arith.constant dense<0xFF800000> : vector<8xf32>
      %90 = vector.multi_reduction <maximumf>, %89, %cst_48 [0] : vector<2x8xf32> to vector<8xf32>
      %91 = vector.shape_cast %90 : vector<8xf32> to vector<1x8xf32>
      %92 = vector.extract_strided_slice %79 {offsets = [8, 0], sizes = [2, 8], strides = [1, 1]} : vector<16x8xf32> to vector<2x8xf32>
      %cst_49 = arith.constant dense<0xFF800000> : vector<8xf32>
      %93 = vector.multi_reduction <maximumf>, %92, %cst_49 [0] : vector<2x8xf32> to vector<8xf32>
      %94 = vector.shape_cast %93 : vector<8xf32> to vector<1x8xf32>
      %95 = vector.extract_strided_slice %79 {offsets = [10, 0], sizes = [2, 8], strides = [1, 1]} : vector<16x8xf32> to vector<2x8xf32>
      %cst_50 = arith.constant dense<0xFF800000> : vector<8xf32>
      %96 = vector.multi_reduction <maximumf>, %95, %cst_50 [0] : vector<2x8xf32> to vector<8xf32>
      %97 = vector.shape_cast %96 : vector<8xf32> to vector<1x8xf32>
      %98 = vector.extract_strided_slice %79 {offsets = [12, 0], sizes = [2, 8], strides = [1, 1]} : vector<16x8xf32> to vector<2x8xf32>
      %cst_51 = arith.constant dense<0xFF800000> : vector<8xf32>
      %99 = vector.multi_reduction <maximumf>, %98, %cst_51 [0] : vector<2x8xf32> to vector<8xf32>
      %100 = vector.shape_cast %99 : vector<8xf32> to vector<1x8xf32>
      %101 = vector.extract_strided_slice %79 {offsets = [14, 0], sizes = [2, 8], strides = [1, 1]} : vector<16x8xf32> to vector<2x8xf32>
      %cst_52 = arith.constant dense<0xFF800000> : vector<8xf32>
      %102 = vector.multi_reduction <maximumf>, %101, %cst_52 [0] : vector<2x8xf32> to vector<8xf32>
      %103 = vector.shape_cast %102 : vector<8xf32> to vector<1x8xf32>
      %104 = tpu.concatenate %82, %85, %88, %91, %94, %97, %100, %103 in 1 : vector<1x8xf32>, vector<1x8xf32>, vector<1x8xf32>, vector<1x8xf32>, vector<1x8xf32>, vector<1x8xf32>, vector<1x8xf32>, vector<1x8xf32> -> vector<1x64xf32>
      %c0_53 = arith.constant 0 : index
      %c0_54 = arith.constant 0 : index
      %105 = vector.load %arg12[%c0_53, %c0_54] : memref<1x64xf32, #tpu.memory_space<vmem>>, vector<1x64xf32>
      tpu.vector_store %arg12[%c0_53, %c0_54], %104 {strides = array<i32>} : memref<1x64xf32, #tpu.memory_space<vmem>>, vector<1x64xf32>,
      %106 = vector.extract_strided_slice %36 {offsets = [0, 0], sizes = [16, 3], strides = [1, 1]} : vector<16x16xf32> to vector<16x3xf32>
      %cst_55 = arith.constant dense<0xFF800000> : vector<16xf32>
      %107 = vector.multi_reduction <maximumf>, %106, %cst_55 [1] : vector<16x3xf32> to vector<16xf32>
      %108 = vector.shape_cast %107 : vector<16xf32> to vector<16x1xf32>
      %109 = vector.extract_strided_slice %36 {offsets = [0, 2], sizes = [16, 4], strides = [1, 1]} : vector<16x16xf32> to vector<16x4xf32>
      %cst_56 = arith.constant dense<0xFF800000> : vector<16xf32>
      %110 = vector.multi_reduction <maximumf>, %109, %cst_56 [1] : vector<16x4xf32> to vector<16xf32>
      %111 = vector.shape_cast %110 : vector<16xf32> to vector<16x1xf32>
      %112 = vector.extract_strided_slice %36 {offsets = [0, 5], sizes = [16, 3], strides = [1, 1]} : vector<16x16xf32> to vector<16x3xf32>
      %cst_57 = arith.constant dense<0xFF800000> : vector<16xf32>
      %113 = vector.multi_reduction <maximumf>, %112, %cst_57 [1] : vector<16x3xf32> to vector<16xf32>
      %114 = vector.shape_cast %113 : vector<16xf32> to vector<16x1xf32>
      %115 = vector.extract_strided_slice %36 {offsets = [0, 8], sizes = [16, 3], strides = [1, 1]} : vector<16x16xf32> to vector<16x3xf32>
      %cst_58 = arith.constant dense<0xFF800000> : vector<16xf32>
      %116 = vector.multi_reduction <maximumf>, %115, %cst_58 [1] : vector<16x3xf32> to vector<16xf32>
      %117 = vector.shape_cast %116 : vector<16xf32> to vector<16x1xf32>
      %118 = vector.extract_strided_slice %36 {offsets = [0, 10], sizes = [16, 4], strides = [1, 1]} : vector<16x16xf32> to vector<16x4xf32>
      %cst_59 = arith.constant dense<0xFF800000> : vector<16xf32>
      %119 = vector.multi_reduction <maximumf>, %118, %cst_59 [1] : vector<16x4xf32> to vector<16xf32>
      %120 = vector.shape_cast %119 : vector<16xf32> to vector<16x1xf32>
      %121 = vector.extract_strided_slice %36 {offsets = [0, 13], sizes = [16, 3], strides = [1, 1]} : vector<16x16xf32> to vector<16x3xf32>
      %cst_60 = arith.constant dense<0xFF800000> : vector<16xf32>
      %122 = vector.multi_reduction <maximumf>, %121, %cst_60 [1] : vector<16x3xf32> to vector<16xf32>
      %123 = vector.shape_cast %122 : vector<16xf32> to vector<16x1xf32>
      %124 = tpu.concatenate %108, %111, %114, %117, %120, %123 in 1 : vector<16x1xf32>, vector<16x1xf32>, vector<16x1xf32>, vector<16x1xf32>, vector<16x1xf32>, vector<16x1xf32> -> vector<16x6xf32>
      %125 = vector.extract_strided_slice %124 {offsets = [0, 0], sizes = [3, 6], strides = [1, 1]} : vector<16x6xf32> to vector<3x6xf32>
      %cst_61 = arith.constant dense<0xFF800000> : vector<6xf32>
      %126 = vector.multi_reduction <maximumf>, %125, %cst_61 [0] : vector<3x6xf32> to vector<6xf32>
      %127 = vector.shape_cast %126 : vector<6xf32> to vector<1x6xf32>
      %128 = vector.extract_strided_slice %124 {offsets = [2, 0], sizes = [4, 6], strides = [1, 1]} : vector<16x6xf32> to vector<4x6xf32>
      %cst_62 = arith.constant dense<0xFF800000> : vector<6xf32>
      %129 = vector.multi_reduction <maximumf>, %128, %cst_62 [0] : vector<4x6xf32> to vector<6xf32>
      %130 = vector.shape_cast %129 : vector<6xf32> to vector<1x6xf32>
      %131 = vector.extract_strided_slice %124 {offsets = [5, 0], sizes = [3, 6], strides = [1, 1]} : vector<16x6xf32> to vector<3x6xf32>
      %cst_63 = arith.constant dense<0xFF800000> : vector<6xf32>
      %132 = vector.multi_reduction <maximumf>, %131, %cst_63 [0] : vector<3x6xf32> to vector<6xf32>
      %133 = vector.shape_cast %132 : vector<6xf32> to vector<1x6xf32>
      %134 = vector.extract_strided_slice %124 {offsets = [8, 0], sizes = [3, 6], strides = [1, 1]} : vector<16x6xf32> to vector<3x6xf32>
      %cst_64 = arith.constant dense<0xFF800000> : vector<6xf32>
      %135 = vector.multi_reduction <maximumf>, %134, %cst_64 [0] : vector<3x6xf32> to vector<6xf32>
      %136 = vector.shape_cast %135 : vector<6xf32> to vector<1x6xf32>
      %137 = vector.extract_strided_slice %124 {offsets = [10, 0], sizes = [4, 6], strides = [1, 1]} : vector<16x6xf32> to vector<4x6xf32>
      %cst_65 = arith.constant dense<0xFF800000> : vector<6xf32>
      %138 = vector.multi_reduction <maximumf>, %137, %cst_65 [0] : vector<4x6xf32> to vector<6xf32>
      %139 = vector.shape_cast %138 : vector<6xf32> to vector<1x6xf32>
      %140 = vector.extract_strided_slice %124 {offsets = [13, 0], sizes = [3, 6], strides = [1, 1]} : vector<16x6xf32> to vector<3x6xf32>
      %cst_66 = arith.constant dense<0xFF800000> : vector<6xf32>
      %141 = vector.multi_reduction <maximumf>, %140, %cst_66 [0] : vector<3x6xf32> to vector<6xf32>
      %142 = vector.shape_cast %141 : vector<6xf32> to vector<1x6xf32>
      %143 = tpu.concatenate %127, %130, %133, %136, %139, %142 in 1 : vector<1x6xf32>, vector<1x6xf32>, vector<1x6xf32>, vector<1x6xf32>, vector<1x6xf32>, vector<1x6xf32> -> vector<1x36xf32>
      %c0_67 = arith.constant 0 : index
      %c0_68 = arith.constant 0 : index
      %144 = vector.load %arg13[%c0_67, %c0_68] : memref<1x36xf32, #tpu.memory_space<vmem>>, vector<1x36xf32>
      tpu.vector_store %arg13[%c0_67, %c0_68], %143 {strides = array<i32>} : memref<1x36xf32, #tpu.memory_space<vmem>>, vector<1x36xf32>,
      %145 = vector.extract_strided_slice %36 {offsets = [0, 0], sizes = [16, 4], strides = [1, 1]} : vector<16x16xf32> to vector<16x4xf32>
      %cst_69 = arith.constant dense<0xFF800000> : vector<16xf32>
      %146 = vector.multi_reduction <maximumf>, %145, %cst_69 [1] : vector<16x4xf32> to vector<16xf32>
      %147 = vector.shape_cast %146 : vector<16xf32> to vector<16x1xf32>
      %148 = vector.extract_strided_slice %36 {offsets = [0, 4], sizes = [16, 4], strides = [1, 1]} : vector<16x16xf32> to vector<16x4xf32>
      %cst_70 = arith.constant dense<0xFF800000> : vector<16xf32>
      %149 = vector.multi_reduction <maximumf>, %148, %cst_70 [1] : vector<16x4xf32> to vector<16xf32>
      %150 = vector.shape_cast %149 : vector<16xf32> to vector<16x1xf32>
      %151 = vector.extract_strided_slice %36 {offsets = [0, 8], sizes = [16, 4], strides = [1, 1]} : vector<16x16xf32> to vector<16x4xf32>
      %cst_71 = arith.constant dense<0xFF800000> : vector<16xf32>
      %152 = vector.multi_reduction <maximumf>, %151, %cst_71 [1] : vector<16x4xf32> to vector<16xf32>
      %153 = vector.shape_cast %152 : vector<16xf32> to vector<16x1xf32>
      %154 = vector.extract_strided_slice %36 {offsets = [0, 12], sizes = [16, 4], strides = [1, 1]} : vector<16x16xf32> to vector<16x4xf32>
      %cst_72 = arith.constant dense<0xFF800000> : vector<16xf32>
      %155 = vector.multi_reduction <maximumf>, %154, %cst_72 [1] : vector<16x4xf32> to vector<16xf32>
      %156 = vector.shape_cast %155 : vector<16xf32> to vector<16x1xf32>
      %157 = tpu.concatenate %147, %150, %153, %156 in 1 : vector<16x1xf32>, vector<16x1xf32>, vector<16x1xf32>, vector<16x1xf32> -> vector<16x4xf32>
      %158 = vector.extract_strided_slice %157 {offsets = [0, 0], sizes = [4, 4], strides = [1, 1]} : vector<16x4xf32> to vector<4x4xf32>
      %cst_73 = arith.constant dense<0xFF800000> : vector<4xf32>
      %159 = vector.multi_reduction <maximumf>, %158, %cst_73 [0] : vector<4x4xf32> to vector<4xf32>
      %160 = vector.shape_cast %159 : vector<4xf32> to vector<1x4xf32>
      %161 = vector.extract_strided_slice %157 {offsets = [4, 0], sizes = [4, 4], strides = [1, 1]} : vector<16x4xf32> to vector<4x4xf32>
      %cst_74 = arith.constant dense<0xFF800000> : vector<4xf32>
      %162 = vector.multi_reduction <maximumf>, %161, %cst_74 [0] : vector<4x4xf32> to vector<4xf32>
      %163 = vector.shape_cast %162 : vector<4xf32> to vector<1x4xf32>
      %164 = vector.extract_strided_slice %157 {offsets = [8, 0], sizes = [4, 4], strides = [1, 1]} : vector<16x4xf32> to vector<4x4xf32>
      %cst_75 = arith.constant dense<0xFF800000> : vector<4xf32>
      %165 = vector.multi_reduction <maximumf>, %164, %cst_75 [0] : vector<4x4xf32> to vector<4xf32>
      %166 = vector.shape_cast %165 : vector<4xf32> to vector<1x4xf32>
      %167 = vector.extract_strided_slice %157 {offsets = [12, 0], sizes = [4, 4], strides = [1, 1]} : vector<16x4xf32> to vector<4x4xf32>
      %cst_76 = arith.constant dense<0xFF800000> : vector<4xf32>
      %168 = vector.multi_reduction <maximumf>, %167, %cst_76 [0] : vector<4x4xf32> to vector<4xf32>
      %169 = vector.shape_cast %168 : vector<4xf32> to vector<1x4xf32>
      %170 = tpu.concatenate %160, %163, %166, %169 in 1 : vector<1x4xf32>, vector<1x4xf32>, vector<1x4xf32>, vector<1x4xf32> -> vector<1x16xf32>
      %c0_77 = arith.constant 0 : index
      %c0_78 = arith.constant 0 : index
      %171 = vector.load %arg14[%c0_77, %c0_78] : memref<1x16xf32, #tpu.memory_space<vmem>>, vector<1x16xf32>
      tpu.vector_store %arg14[%c0_77, %c0_78], %170 {strides = array<i32>} : memref<1x16xf32, #tpu.memory_space<vmem>>, vector<1x16xf32>,
    } else {
    }
    %c0 = arith.constant 0 : index
    %c0_1 = arith.constant 0 : index
    %c0_2 = arith.constant 0 : index
    %3 = vector.load %arg3[%c0, %c0_1, %c0_2] : memref<1x4x256xf32, #tpu.memory_space<vmem>>, vector<1x4x256xf32>
    %4 = vector.shape_cast %3 : vector<1x4x256xf32> to vector<4x256xf32>
    %c0_3 = arith.constant 0 : index
    %c0_4 = arith.constant 0 : index
    %5 = vector.load %arg11[%c0_3, %c0_4] : memref<1x256xf32, #tpu.memory_space<vmem>>, vector<1x256xf32>
    %6 = vector.broadcast %5 : vector<1x256xf32> to vector<4x256xf32>
    %7 = arith.addf %4, %6 : vector<4x256xf32>
    %c0_5 = arith.constant 0 : index
    %c0_6 = arith.constant 0 : index
    %c0_7 = arith.constant 0 : index
    %8 = vector.load %arg7[%c0_5, %c0_6, %c0_7] : memref<1x4x256xf32, #tpu.memory_space<vmem>>, vector<1x4x256xf32>
    %9 = vector.shape_cast %8 : vector<1x4x256xf32> to vector<4x256xf32>
    %10 = vector.shape_cast %7 : vector<4x256xf32> to vector<1x4x256xf32>
    tpu.vector_store %arg7[%c0_5, %c0_6, %c0_7], %10 {strides = array<i32>} : memref<1x4x256xf32, #tpu.memory_space<vmem>>, vector<1x4x256xf32>,
    %c0_8 = arith.constant 0 : index
    %c0_9 = arith.constant 0 : index
    %c0_10 = arith.constant 0 : index
    %11 = vector.load %arg4[%c0_8, %c0_9, %c0_10] : memref<1x4x64xf32, #tpu.memory_space<vmem>>, vector<1x4x64xf32>
    %12 = vector.shape_cast %11 : vector<1x4x64xf32> to vector<4x64xf32>
    %c0_11 = arith.constant 0 : index
    %c0_12 = arith.constant 0 : index
    %13 = vector.load %arg12[%c0_11, %c0_12] : memref<1x64xf32, #tpu.memory_space<vmem>>, vector<1x64xf32>
    %14 = vector.broadcast %13 : vector<1x64xf32> to vector<4x64xf32>
    %15 = arith.addf %12, %14 : vector<4x64xf32>
    %c0_13 = arith.constant 0 : index
    %c0_14 = arith.constant 0 : index
    %c0_15 = arith.constant 0 : index
    %16 = vector.load %arg8[%c0_13, %c0_14, %c0_15] : memref<1x4x64xf32, #tpu.memory_space<vmem>>, vector<1x4x64xf32>
    %17 = vector.shape_cast %16 : vector<1x4x64xf32> to vector<4x64xf32>
    %18 = vector.shape_cast %15 : vector<4x64xf32> to vector<1x4x64xf32>
    tpu.vector_store %arg8[%c0_13, %c0_14, %c0_15], %18 {strides = array<i32>} : memref<1x4x64xf32, #tpu.memory_space<vmem>>, vector<1x4x64xf32>,
    %c0_16 = arith.constant 0 : index
    %c0_17 = arith.constant 0 : index
    %c0_18 = arith.constant 0 : index
    %19 = vector.load %arg5[%c0_16, %c0_17, %c0_18] : memref<1x4x36xf32, #tpu.memory_space<vmem>>, vector<1x4x36xf32>
    %20 = vector.shape_cast %19 : vector<1x4x36xf32> to vector<4x36xf32>
    %c0_19 = arith.constant 0 : index
    %c0_20 = arith.constant 0 : index
    %21 = vector.load %arg13[%c0_19, %c0_20] : memref<1x36xf32, #tpu.memory_space<vmem>>, vector<1x36xf32>
    %22 = vector.broadcast %21 : vector<1x36xf32> to vector<4x36xf32>
    %23 = arith.addf %20, %22 : vector<4x36xf32>
    %c0_21 = arith.constant 0 : index
    %c0_22 = arith.constant 0 : index
    %c0_23 = arith.constant 0 : index
    %24 = vector.load %arg9[%c0_21, %c0_22, %c0_23] : memref<1x4x36xf32, #tpu.memory_space<vmem>>, vector<1x4x36xf32>
    %25 = vector.shape_cast %24 : vector<1x4x36xf32> to vector<4x36xf32>
    %26 = vector.shape_cast %23 : vector<4x36xf32> to vector<1x4x36xf32>
    tpu.vector_store %arg9[%c0_21, %c0_22, %c0_23], %26 {strides = array<i32>} : memref<1x4x36xf32, #tpu.memory_space<vmem>>, vector<1x4x36xf32>,
    %c0_24 = arith.constant 0 : index
    %c0_25 = arith.constant 0 : index
    %c0_26 = arith.constant 0 : index
    %27 = vector.load %arg6[%c0_24, %c0_25, %c0_26] : memref<1x4x16xf32, #tpu.memory_space<vmem>>, vector<1x4x16xf32>
    %28 = vector.shape_cast %27 : vector<1x4x16xf32> to vector<4x16xf32>
    %c0_27 = arith.constant 0 : index
    %c0_28 = arith.constant 0 : index
    %29 = vector.load %arg14[%c0_27, %c0_28] : memref<1x16xf32, #tpu.memory_space<vmem>>, vector<1x16xf32>
    %30 = vector.broadcast %29 : vector<1x16xf32> to vector<4x16xf32>
    %31 = arith.addf %28, %30 : vector<4x16xf32>
    %c0_29 = arith.constant 0 : index
    %c0_30 = arith.constant 0 : index
    %c0_31 = arith.constant 0 : index
    %32 = vector.load %arg10[%c0_29, %c0_30, %c0_31] : memref<1x4x16xf32, #tpu.memory_space<vmem>>, vector<1x4x16xf32>
    %33 = vector.shape_cast %32 : vector<1x4x16xf32> to vector<4x16xf32>
    %34 = vector.shape_cast %31 : vector<4x16xf32> to vector<1x4x16xf32>
    tpu.vector_store %arg10[%c0_29, %c0_30, %c0_31], %34 {strides = array<i32>} : memref<1x4x16xf32, #tpu.memory_space<vmem>>, vector<1x4x16xf32>,
    return
  }
  func.func @transform_0(%arg0: i32, %arg1: i32) -> (i32, i32, i32, i32) {
    %c0_i32 = arith.constant 0 : i32
    %c0_i32_0 = arith.constant 0 : i32
    %c0_i32_1 = arith.constant 0 : i32
    %c0_i32_2 = arith.constant 0 : i32
    return %arg0, %c0_i32, %c0_i32_0, %c0_i32_1 : i32, i32, i32, i32
  }
  func.func @transform_1(%arg0: i32, %arg1: i32) -> (i32, i32, i32) {
    %c0_i32 = arith.constant 0 : i32
    %c0_i32_0 = arith.constant 0 : i32
    return %arg0, %arg1, %c0_i32 : i32, i32, i32
  }
  func.func @transform_2(%arg0: i32, %arg1: i32) -> (i32, i32, i32) {
    %c0_i32 = arith.constant 0 : i32
    %c0_i32_0 = arith.constant 0 : i32
    return %arg0, %arg1, %c0_i32 : i32, i32, i32
  }
  func.func @transform_3(%arg0: i32, %arg1: i32) -> (i32, i32, i32) {
    %c0_i32 = arith.constant 0 : i32
    %c0_i32_0 = arith.constant 0 : i32
    return %arg0, %arg1, %c0_i32 : i32, i32, i32
  }
  func.func @transform_4(%arg0: i32, %arg1: i32) -> (i32, i32, i32) {
    %c0_i32 = arith.constant 0 : i32
    %c0_i32_0 = arith.constant 0 : i32
    return %arg0, %arg1, %c0_i32 : i32, i32, i32
  }
  func.func @transform_5(%arg0: i32, %arg1: i32) -> (i32, i32, i32) {
    %c0_i32 = arith.constant 0 : i32
    %c0_i32_0 = arith.constant 0 : i32
    return %arg0, %arg1, %c0_i32 : i32, i32, i32
  }
  func.func @transform_6(%arg0: i32, %arg1: i32) -> (i32, i32, i32) {
    %c0_i32 = arith.constant 0 : i32
    %c0_i32_0 = arith.constant 0 : i32
    return %arg0, %arg1, %c0_i32 : i32, i32, i32
  }
  func.func @transform_7(%arg0: i32, %arg1: i32) -> (i32, i32, i32) {
    %c0_i32 = arith.constant 0 : i32
    %c0_i32_0 = arith.constant 0 : i32
    return %arg0, %arg1, %c0_i32 : i32, i32, i32
  }
  func.func @transform_8(%arg0: i32, %arg1: i32) -> (i32, i32, i32) {
    %c0_i32 = arith.constant 0 : i32
    %c0_i32_0 = arith.constant 0 : i32
    return %arg0, %arg1, %c0_i32 : i32, i32, i32
  }
}

</mosaic_0001>

<bundles_post_ra>
// kernel: adaptive_maxpool_add_fused.1
= control target key start
LH: loop header
LB: loop body
LE: loop exit
PB: predicated region body
PF: predicated region fallthrough
CT: control target
= control target key end

     0   :  { %s1464_s27 = smov 0   ;;  %s1466_s28 = smov 0   ;;  %s1708_s0 = inlined_call_operand.vmem [shape: f32[2,1,16,16], index: 0, kind: input, shape index: {}]   ;;  %s1709_s1 = inlined_call_operand.vmem [shape: f32[2,4,256], index: 1, kind: input, shape index: {}]   ;;  %s1710_s2 = inlined_call_operand.vmem [shape: f32[2,4,64], index: 2, kind: input, shape index: {}]   ;;  %s1711_s3 = inlined_call_operand.vmem [shape: f32[2,4,36], index: 3, kind: input, shape index: {}]   ;;  %s1712_s4 = inlined_call_operand.vmem [shape: f32[2,4,16], index: 4, kind: input, shape index: {}]   ;;  %s1713_s5 = inlined_call_operand.vmem [shape: f32[2,4,256], index: 5, kind: output, shape index: {0}]   ;;  %s1714_s6 = inlined_call_operand.vmem [shape: f32[2,4,64], index: 6, kind: output, shape index: {1}]   ;;  %s1715_s7 = inlined_call_operand.vmem [shape: f32[2,4,36], index: 7, kind: output, shape index: {2}]   ;;  %s1716_s8 = inlined_call_operand.vmem [shape: f32[2,4,16], index: 8, kind: output, shape index: {3}]  }
   0x1   :  { %s1468_s29 = smov 0  }
   0x2 LB: > { %s31_s30 = sadd.s32 1, %s1396_s28  ;;  %p1316_p0 = scmp.ge.s32.totalorder %s1400_s29, 1  ;;  %s1400_s29 = sphi %s1468_s29, %s19_s29   ;;  %s1396_s28 = sphi %s1466_s28, %s1720_s28   ;;  %s1392_s27 = sphi %s1464_s27, %s1719_s27  }
   0x3   : > { %p33_p1 = scmp.ge.s32.totalorder %s31_s30, 2  ;;  %p347_p2 = scmp.lt.s32.totalorder %s1400_s29, 3 }
   0x5   : > { %s1722_s30 = smov (%p33_p1, %s31_s30), 0  ;;  %p348_p3 = pnand %p1316_p0, %p347_p2 }
   0x6   : > { %p436_p4 = scmp.lt.s32.totalorder (!%p348_p3), %s1392_s27, 1  ;;  %s1402_s13 = smov (!%p348_p3), 48   ;;  %vm609_vm0 = vcmask (!%p348_p3), 15360   ;;  %vm623_vm1 = vcmask (!%p348_p3), 48160   ;;  %vm616_vm2 = vcmask (!%p348_p3), 31760   ;;  %vm630_vm3 = vcmask (!%p348_p3), 64560  }
   0x7   : > { %351 = sbr.rel (%p348_p3) target bundleno = 458 (0x1ca), region = 40  ;;  %s1403_s14 = smov (!%p348_p3), 16   ;;  %vm637_vm4 = vcmask (!%p348_p3), 80960   ;;  %vm644_vm5 = vcmask (!%p348_p3), 97360   ;;  %vm670_vm6 = vcmask (!%p348_p3), 23552   ;;  %vm792_vm7 = vcmask (!%p348_p3), 48144  }
   0x8   : > { %s1404_s15 = smov (!%p348_p3), 64   ;;  %s1405_s16 = smov (!%p348_p3), 32   ;;  %vm651_vm8 = vcmask (!%p348_p3), 113760   ;;  %vm799_vm9 = vcmask (!%p348_p3), 64552   ;;  %vm658_vm10 = vcmask (!%p348_p3), 130160   ;;  %vm806_vm11 = vcmask (!%p348_p3), 89152  }
   0x9   : > { %s1406_s17 = smov (!%p348_p3), 96   ;;  %s1407_s18 = smov (!%p348_p3), 80   ;;  %vm813_vm12 = vcmask (!%p348_p3), 113744   ;;  %vm820_vm13 = vcmask (!%p348_p3), 130152   ;;  %vm673_vm14 = vcmask (!%p348_p3), 31744   ;;  %vm918_vm15 = vcmask (!%p348_p3), 64544  }
   0xa   : > { %s1408_s19 = smov (!%p348_p3), 112   ;;  %s1411_s10 = smov (!%p348_p3), 8  }
   0xb   : > { %s1412_s11 = smov (!%p348_p3), 24  }
   0xe   : > { %s1724_s27 = smov (!%p436_p4, %s1392_s27), 1 }
   0xf   : > { %s1334_s9 = sshll.u32 %s1724_s27, 4  ;;  %s1335_s20 = sshll.u32 %s1724_s27, 3 }
  0x10   : > { %s440_s12 = scalar_lea.vmem %s1708_s0, %s1334_s9  ;;  %s449_s23 = scalar_lea.vmem %s1709_s1, %s1335_s20 }
  0x11   : > { %v1488_v0 = vld [vmem:[%s440_s12] sm:$0xff]  ;;  %v1499_v7 = vld [vmem:[%s440_s12 + $0x8] sm:$0xff]  ;;  %s479_s26 = scalar_lea.vmem %s1713_s5, %s1335_s20  ;;  %s1410_s9 = smov 4  }
  0x12   : > { %v516_v1 = vrot.slane %v1488_v0, 3  ;;  %v508_v2 = vrot.slane %v1488_v0, 1  ;;  %v520_v3 = vrot.slane %v1488_v0, 4  ;;  %v512_v4 = vrot.slane %v1488_v0, 2  ;;  %s1413_s12 = smov 6  }
  0x13   : > { %v528_v5 = vrot.slane %v1488_v0, 6  ;;  %v524_v6 = vrot.slane %v1488_v0, 5  ;;  %v537_v8 = vrot.slane %v1499_v7, 1  ;;  %v532_v9 = vrot.slane %v1488_v0, 7 }
  0x14   : > { %517 = vrot.lane.b32.xlu1 %v516_v1, %s1402_s13  ;;  %509 = vrot.lane.b32.xlu0 %v508_v2, %s1403_s14  ;;  %v545_v10 = vrot.slane %v1499_v7, 3  ;;  %v541_v11 = vrot.slane %v1499_v7, 2  ;;  %v553_v12 = vrot.slane %v1499_v7, 5  ;;  %v549_v13 = vrot.slane %v1499_v7, 4 }
  0x15   : > { %v561_v14 = vrot.slane %v1499_v7, 7  ;;  %v557_v15 = vrot.slane %v1499_v7, 6  ;;  %v610_v16 = vsel %vm609_vm0, %v1488_v0, -inf  ;;  %v624_v17 = vsel %vm623_vm1, %v1488_v0, -inf }
  0x16   : > { %v617_v18 = vsel %vm616_vm2, %v1488_v0, -inf  ;;  %v631_v19 = vsel %vm630_vm3, %v1488_v0, -inf  ;;  %v613_v20 = vsel %vm609_vm0, %v1499_v7, -inf  ;;  %v620_v21 = vsel %vm616_vm2, %v1499_v7, -inf }
  0x17   : > { %v638_v22 = vsel %vm637_vm4, %v1488_v0, -inf  ;;  %v627_v23 = vsel %vm623_vm1, %v1499_v7, -inf  ;;  %v645_v24 = vsel %vm644_vm5, %v1488_v0, -inf  ;;  %v786_v25 = vsel %vm670_vm6, %v1488_v0, -inf }
  0x18   : > { %521 = vrot.lane.b32.xlu1 %v520_v3, %s1404_s15  ;;  %513 = vrot.lane.b32.xlu0 %v512_v4, %s1405_s16  ;;  %v793_v26 = vsel %vm792_vm7, %v1488_v0, -inf  ;;  %v634_v27 = vsel %vm630_vm3, %v1499_v7, -inf  ;;  %v652_v28 = vsel %vm651_vm8, %v1488_v0, -inf  ;;  %v800_v29 = vsel %vm799_vm9, %v1488_v0, -inf }
  0x19   : > { %v641_v30 = vsel %vm637_vm4, %v1499_v7, -inf  ;;  %v659_v31 = vsel %vm658_vm10, %v1488_v0, -inf  ;;  %v789_v32 = vsel %vm670_vm6, %v1499_v7, -inf  ;;  %v796_v33 = vsel %vm792_vm7, %v1499_v7, -inf }
  0x1a   : > { %v807_v34 = vsel %vm806_vm11, %v1488_v0, -inf  ;;  %v648_v35 = vsel %vm644_vm5, %v1499_v7, -inf  ;;  %v803_v36 = vsel %vm799_vm9, %v1499_v7, -inf  ;;  %v814_v37 = vsel %vm813_vm12, %v1488_v0, -inf }
  0x1b   : > { %v655_v38 = vsel %vm651_vm8, %v1499_v7, -inf  ;;  %v810_v39 = vsel %vm806_vm11, %v1499_v7, -inf  ;;  %v821_v40 = vsel %vm820_vm13, %v1488_v0, -inf  ;;  %v912_v41 = vsel %vm673_vm14, %v1488_v0, -inf }
  0x1c   : > { %529 = vrot.lane.b32.xlu1 %v528_v5, %s1406_s17  ;;  %525 = vrot.lane.b32.xlu0 %v524_v6, %s1407_s18  ;;  %v919_v42 = vsel %vm918_vm15, %v1488_v0, -inf  ;;  %v662_v43 = vsel %vm658_vm10, %v1499_v7, -inf  ;;  %v817_v44 = vsel %vm813_vm12, %v1499_v7, -inf  ;;  %v915_v45 = vsel %vm673_vm14, %v1499_v7, -inf }
  0x1d   : > { %v922_v46 = vsel %vm918_vm15, %v1499_v7, -inf  ;;  %vm925_vm1 = vcmask 97344   ;;  %v824_v50 = vsel %vm820_vm13, %v1499_v7, -inf  ;;  %vm932_vm2 = vcmask 130144  }
  0x1e   : > { %v926_v49 = vsel %vm925_vm1, %v1488_v0, -inf  ;;  %v929_v53 = vsel %vm925_vm1, %v1499_v7, -inf  ;;  %v933_v54 = vsel %vm932_vm2, %v1488_v0, -inf  ;;  %vm565_vm3 = vcmask 130048  }
  0x1f   : > { %vm567_vm4 = vcmask 261120   ;;  %v936_v57 = vsel %vm932_vm2, %v1499_v7, -inf  ;;  %vm1717_vm5 = vcmask 392192   ;;  %vm571_vm7 = vcmask 523264  }
  0x20   : > { %538 = vrot.lane.b32.xlu1 %v537_v8, %s1403_s14  ;;  %533 = vrot.lane.b32.xlu0 %v532_v9, %s1408_s19  ;;  %v1409_v4 = vmov 1966171168   ;;  %v592_v6 = vlaneseq  ;;  %vm573_vm8 = vcmask 654336   ;;  %vm575_vm9 = vcmask 785408  }
  0x21   : > { %v590_v5 = vunpack.c.l.s4 %v1409_v4  ;;  %vm577_vm10 = vcmask 916480   ;;  %vm665_vm12 = vcmask 7168   ;;  %vm676_vm13 = vcmask 39936  }
  0x22   : > { %vm606_vm11 = vcmp.lt.s32.totalorder %v592_v6, 256  ;;  %vm679_vm15 = vcmask 48128   ;;  %vm682_vm1 = vcmask 56320   ;;  %vm685_vm2 = vcmask 58368  }
  0x24   : > { %546 = vrot.lane.b32.xlu1 %v545_v10, %s1402_s13  ;;  %542 = vrot.lane.b32.xlu0 %v541_v11, %s1405_s16 }
  0x28   : > { %554 = vrot.lane.b32.xlu1 %v553_v12, %s1407_s18  ;;  %550 = vrot.lane.b32.xlu0 %v549_v13, %s1404_s15  ;;  %v591_v12 = vunpack.c.0.s8 %v590_v5  ;;  %v593_v13 = vshrl.u32 %v592_v6, 7  ;;  %s1414_s15 = smov 12   ;;  %s1417_s18 = smov 56  }
  0x2c   : > { %562 = vrot.lane.b32.xlu1 %v561_v14, %s1408_s19  ;;  %558 = vrot.lane.b32.xlu0 %v557_v15, %s1406_s17  ;;  %s1415_s17 = smov 18  }
  0x4b   : > { %611 = vmax.xlane.f32.xlu0 %v610_v16 }
  0x4f   : > { %625 = vmax.xlane.f32.xlu0 %v624_v17 }
  0x50   : > { %618 = vmax.xlane.f32.xlu1 %v617_v18 }
  0x53   : > { %632 = vmax.xlane.f32.xlu0 %v631_v19  ;;  %v594_v19 = vsub.s32 %v591_v12, %v593_v13 }
  0x54   : > { %614 = vmax.xlane.f32.xlu1 %v613_v20 }
  0x57   : > { %621 = vmax.xlane.f32.xlu0 %v620_v21 }
  0x58   : > { %639 = vmax.xlane.f32.xlu1 %v638_v22 }
  0x5b   : > { %628 = vmax.xlane.f32.xlu0 %v627_v23 }
  0x5c   : > { %646 = vmax.xlane.f32.xlu1 %v645_v24 }
  0x5f   : > { %787 = vmax.xlane.f32.xlu0 %v786_v25  ;;  %v997_v25 = vsub.s32 0, %v593_v13 }
  0x60   : > { %794 = vmax.xlane.f32.xlu1 %v793_v26  ;;  %v1001_v26 = vsub.s32 1, %v593_v13 }
  0x63   : > { %635 = vmax.xlane.f32.xlu0 %v634_v27 }
  0x64   : > { %653 = vmax.xlane.f32.xlu1 %v652_v28 }
  0x67   : > { %801 = vmax.xlane.f32.xlu0 %v800_v29 }
  0x68   : > { %642 = vmax.xlane.f32.xlu1 %v641_v30  ;;  %v992_v30 = vld [vmem:[%s449_s23] sm:$0xff] }
  0x6b   : > { %660 = vmax.xlane.f32.xlu0 %v659_v31 }
  0x6c   : > { %790 = vmax.xlane.f32.xlu1 %v789_v32 }
  0x6f   : > { %797 = vmax.xlane.f32.xlu0 %v796_v33 }
  0x70   : > { %808 = vmax.xlane.f32.xlu1 %v807_v34 }
  0x73   : > { %649 = vmax.xlane.f32.xlu0 %v648_v35 }
  0x74   : > { %804 = vmax.xlane.f32.xlu1 %v803_v36 }
  0x77   : > { %815 = vmax.xlane.f32.xlu0 %v814_v37 }
  0x78   : > { %656 = vmax.xlane.f32.xlu1 %v655_v38 }
  0x7b   : > { %811 = vmax.xlane.f32.xlu0 %v810_v39 }
  0x7c   : > { %822 = vmax.xlane.f32.xlu1 %v821_v40 }
  0x7f   : > { %913 = vmax.xlane.f32.xlu0 %v912_v41 }
  0x80   : > { %920 = vmax.xlane.f32.xlu1 %v919_v42 }
  0x83   : > { %663 = vmax.xlane.f32.xlu0 %v662_v43 }
  0x84   : > { %818 = vmax.xlane.f32.xlu1 %v817_v44 }
  0x86   : > { %v510_v47 = vpop.permute.xlu0 %509  ;;  %v518_v48 = vpop.permute.xlu1 %517 }
  0x87   : > { %916 = vmax.xlane.f32.xlu0 %v915_v45  ;;  %v566_v58 = vsel %vm565_vm3, %v1488_v0, %v510_v47 }
  0x88   : > { %923 = vmax.xlane.f32.xlu1 %v922_v46 }
  0x8a   : > { %v514_v51 = vpop.permute.xlu0 %513  ;;  %v522_v52 = vpop.permute.xlu1 %521 }
  0x8b   : > { %927 = vmax.xlane.f32.xlu0 %v926_v49  ;;  %v568_v61 = vsel %vm567_vm4, %v566_v58, %v514_v51 }
  0x8c   : > { %825 = vmax.xlane.f32.xlu1 %v824_v50  ;;  %v570_v63 = vsel %vm1717_vm5, %v568_v61, %v518_v48 }
  0x8d   : > { %v572_v0 = vsel %vm571_vm7, %v570_v63, %v522_v52 }
  0x8e   : > { %v526_v55 = vpop.permute.xlu0 %525  ;;  %v530_v56 = vpop.permute.xlu1 %529 }
  0x8f   : > { %930 = vmax.xlane.f32.xlu0 %v929_v53 }
  0x90   : > { %934 = vmax.xlane.f32.xlu1 %v933_v54 }
  0x92   : > { %v534_v59 = vpop.permute.xlu0 %533  ;;  %v539_v60 = vpop.permute.xlu1 %538 }
  0x93   : > { %937 = vmax.xlane.f32.xlu0 %v936_v57  ;;  %v579_v62 = vsel %vm565_vm3, %v1499_v7, %v539_v60  ;;  %v574_v7 = vsel %vm573_vm8, %v572_v0, %v526_v55 }
  0x94   : > { %v576_v17 = vsel %vm575_vm9, %v574_v7, %v530_v56 }
  0x95   : > { %v578_v20 = vsel %vm577_vm10, %v576_v17, %v534_v59 }
  0x96   : > { %v543_v1 = vpop.permute.xlu0 %542  ;;  %v547_v2 = vpop.permute.xlu1 %546 }
  0x97   : > { %v580_v3 = vsel %vm567_vm4, %v579_v62, %v543_v1 }
  0x98   : > { %v581_v8 = vsel %vm1717_vm5, %v580_v3, %v547_v2  ;;  %vm953_vm5 = vcmask 31748  }
  0x9a   : > { %v551_v9 = vpop.permute.xlu0 %550  ;;  %v555_v10 = vpop.permute.xlu1 %554 }
  0x9b   : > { %v582_v11 = vsel %vm571_vm7, %v581_v8, %v551_v9  ;;  %vm837_vm7 = vcmask 43008  }
  0x9c   : > { %v583_v14 = vsel %vm573_vm8, %v582_v11, %v555_v10  ;;  %vm845_vm8 = vcmask 46082  }
  0x9e   : > { %v559_v15 = vpop.permute.xlu0 %558  ;;  %v563_v16 = vpop.permute.xlu1 %562 }
  0x9f   : > { %v584_v18 = vsel %vm575_vm9, %v583_v14, %v559_v15  ;;  %vm701_vm9 = vcmask 62468  }
  0xa0   : > { %v585_v21 = vsel %vm577_vm10, %v584_v18, %v563_v16  ;;  %vm853_vm10 = vcmask 48133  }
  0xa1   : > { %v588_v22 = vcombine.low %v578_v20, %v585_v21 }
  0xa3   : > { %v595_v23 = vrot.slane %v588_v22, %v594_v19 }
  0xa5   : > { %v602_v24 = vrot.slane %v595_v23, %v594_v19 }
  0xa7   : > { %608 = vst.msk [vmem:[#allocation2] sm:$0x3] %vm606_vm11, %v602_v24  ;;  %vm945_vm11 = vcmask 27648  }
  0xae   : > { %v993_v27 = vld [vmem:[#allocation2] sm:$0x3] }
  0xaf   : > { %v998_v28 = vrot.slane %v993_v27, %v997_v25  ;;  %v1002_v29 = vrot.slane %v993_v27, %v1001_v26 }
  0xb1   : > { %v1003_v31 = vcombine.low %v998_v28, %v1002_v29 }
  0xb3   : > { %v1005_v32 = vadd.f32 %v1003_v31, %v992_v30 }
  0xb5   : > { %1006 = vst [vmem:[%s479_s26] sm:$0xff] %v1005_v32 }
  0xd8   : > { %v612_v33 = vpop.xlane.xlu0 %611 }
  0xdc   : > { %v626_v34 = vpop.xlane.xlu0 %625 }
  0xdd   : > { %v619_v35 = vpop.xlane.xlu1 %618 }
  0xde   : > { %v666_v36 = vsel %vm665_vm12, %v612_v33, %v619_v35 }
  0xdf   : > { %v668_v37 = vsel %vm609_vm0, %v666_v36, %v626_v34 }
  0xe0   : > { %v633_v38 = vpop.xlane.xlu0 %632 }
  0xe1   : > { %v671_v39 = vsel %vm670_vm6, %v668_v37, %v633_v38  ;;  %v615_v40 = vpop.xlane.xlu1 %614 }
  0xe4   : > { %v622_v41 = vpop.xlane.xlu0 %621 }
  0xe5   : > { %v667_v42 = vsel %vm665_vm12, %v615_v40, %v622_v41  ;;  %v640_v43 = vpop.xlane.xlu1 %639 }
  0xe6   : > { %v674_v52 = vsel %vm673_vm14, %v671_v39, %v640_v43 }
  0xe8   : > { %v629_v44 = vpop.xlane.xlu0 %628 }
  0xe9   : > { %v647_v45 = vpop.xlane.xlu1 %646  ;;  %v669_v17 = vsel %vm609_vm0, %v667_v42, %v629_v44 }
  0xea   : > { %v677_v53 = vsel %vm676_vm13, %v674_v52, %v647_v45 }
  0xec   : > { %v788_v46 = vpop.xlane.xlu0 %787 }
  0xed   : > { %v795_v47 = vpop.xlane.xlu1 %794 }
  0xee   : > { %v827_v2 = vsel %vm665_vm12, %v788_v46, %v795_v47 }
  0xf0   : > { %v636_v48 = vpop.xlane.xlu0 %635 }
  0xf1   : > { %v654_v49 = vpop.xlane.xlu1 %653  ;;  %v672_v20 = vsel %vm670_vm6, %v669_v17, %v636_v48 }
  0xf2   : > { %v680_v54 = vsel %vm679_vm15, %v677_v53, %v654_v49 }
  0xf4   : > { %v802_v50 = vpop.xlane.xlu0 %801 }
  0xf5   : > { %v643_v51 = vpop.xlane.xlu1 %642  ;;  %v829_v3 = vsel %vm609_vm0, %v827_v2, %v802_v50 }
  0xf6   : > { %v675_v23 = vsel %vm673_vm14, %v672_v20, %v643_v51 }
  0xf8   : > { %v661_v55 = vpop.xlane.xlu0 %660 }
  0xf9   : > { %v1599_v56 = vsel %vm682_vm1, %v680_v54, %v661_v55  ;;  %v791_v57 = vpop.xlane.xlu1 %790 }
  0xfa   : > { %v1603_v58 = vsel %vm685_vm2, %v1599_v56, -inf  ;;  %v702_v26 = vsel %vm701_vm9, %v1599_v56, -inf }
  0xfb   : > { %v703_v38 = vrot.slane %v702_v26, 4 }
  0xfc   : > { %v798_v59 = vpop.xlane.xlu0 %797 }
  0xfd   : > { %v809_v60 = vpop.xlane.xlu1 %808  ;;  %v828_v15 = vsel %vm665_vm12, %v791_v57, %v798_v59  ;;  %v704_v51 = vmax.f32 %v702_v26, %v703_v38 }
  0xfe   : > { %v831_v4 = vsel %vm670_vm6, %v829_v3, %v809_v60 }
 0x100   : > { %v650_v61 = vpop.xlane.xlu0 %649 }
 0x101   : > { %v805_v62 = vpop.xlane.xlu1 %804  ;;  %v678_v27 = vsel %vm676_vm13, %v675_v23, %v650_v61 }
 0x102   : > { %v830_v16 = vsel %vm609_vm0, %v828_v15, %v805_v62 }
 0x104   : > { %v816_v63 = vpop.xlane.xlu0 %815 }
 0x105   : > { %v657_v1 = vpop.xlane.xlu1 %656  ;;  %v833_v6 = vsel %vm673_vm14, %v831_v4, %v816_v63 }
 0x106   : > { %v681_v29 = vsel %vm679_vm15, %v678_v27, %v657_v1 }
 0x108   : > { %v812_v5 = vpop.xlane.xlu0 %811 }
 0x109   : > { %v823_v0 = vpop.xlane.xlu1 %822  ;;  %v832_v18 = vsel %vm670_vm6, %v830_v16, %v812_v5 }
 0x10a   : > { %v835_v8 = vsel %vm676_vm13, %v833_v6, %v823_v0  ;;  %v705_v6 = vrot.slane %v704_v51, 2 }
 0x10b   : > { %v1611_v9 = vsel %vm837_vm7, %v835_v8, -inf  ;;  %v846_v24 = vsel %vm845_vm8, %v835_v8, -inf  ;;  %v854_v34 = vsel %vm853_vm10, %v835_v8, -inf }
 0x10c   : > { %v914_v10 = vpop.xlane.xlu0 %913  ;;  %v847_v33 = vrot.slane %v846_v24, 4  ;;  %v855_v44 = vrot.slane %v854_v34, 4  ;;  %v706_v20 = vmax.f32 %v704_v51, %v705_v6 }
 0x10d   : > { %v921_v11 = vpop.xlane.xlu1 %920 }
 0x10e   : > { %v939_v30 = vsel %vm665_vm12, %v914_v10, %v921_v11  ;;  %v848_v48 = vmax.f32 %v846_v24, %v847_v33  ;;  %v856_v62 = vmax.f32 %v854_v34, %v855_v44  ;;  %v707_v34 = vrot.slane %v706_v20, 1 }
 0x110   : > { %v664_v12 = vpop.xlane.xlu0 %663  ;;  %v849_v63 = vrot.slane %v848_v48, 2 }
 0x111   : > { %v819_v13 = vpop.xlane.xlu1 %818  ;;  %v684_v35 = vsel %vm682_vm1, %v681_v29, %v664_v12  ;;  %vm903_vm1 = vcmask 97280  }
 0x112   : > { %v834_v21 = vsel %vm673_vm14, %v832_v18, %v819_v13  ;;  %v717_v45 = vsel %vm685_vm2, %v684_v35, -inf  ;;  %v850_v17 = vmax.f32 %v848_v48, %v849_v63  ;;  %vm990_vm2 = vcmask 122880  }
 0x113   : > { %v718_v55 = vrot.slane %v717_v45, 4 }
 0x114   : > { %v917_v7 = vpop.xlane.xlu0 %916 }
 0x115   : > { %v924_v14 = vpop.xlane.xlu1 %923  ;;  %v719_v0 = vmax.f32 %v717_v45, %v718_v55 }
 0x116   : > { %v940_v40 = vsel %vm665_vm12, %v917_v7, %v924_v14  ;;  %vm709_vm12 = vcmask 64518   ;;  %v857_v7 = vrot.slane %v856_v62, 2 }
 0x117   : > { %v738_v5 = vsel %vm709_vm12, %v684_v35, -inf  ;;  %v710_v13 = vsel %vm709_vm12, %v1599_v56, -inf  ;;  %v720_v24 = vrot.slane %v719_v0, 2 }
 0x118   : > { %v928_v19 = vpop.xlane.xlu0 %927  ;;  %v711_v27 = vrot.slane %v710_v13, 4 }
 0x119   : > { %v826_v22 = vpop.xlane.xlu1 %825  ;;  %v941_v36 = vsel %vm609_vm0, %v939_v30, %v928_v19  ;;  %v739_v19 = vrot.slane %v738_v5, 4  ;;  %v851_v30 = vrot.slane %v850_v17, 1  ;;  %v721_v38 = vmax.f32 %v719_v0, %v720_v24 }
 0x11a   : > { %v1621_v25 = vsel %vm676_vm13, %v834_v21, %v826_v22  ;;  %vm693_vm13 = vcmask 60418  }
 0x11b   : > { %v868_v28 = vsel %vm845_vm8, %v1621_v25, -inf  ;;  %v724_v52 = vsel %vm693_vm13, %v684_v35, -inf  ;;  %v861_v53 = vsel %vm837_vm7, %v1621_v25, -inf  ;;  %v694_v61 = vsel %vm693_vm13, %v1599_v56, -inf }
 0x11c   : > { %v869_v31 = vrot.slane %v868_v28, 4  ;;  %v931_v32 = vpop.xlane.xlu0 %930  ;;  %v862_v1 = vrot.slane %v861_v53, 4  ;;  %v725_v4 = vrot.slane %v724_v52, 4  ;;  %v695_v12 = vrot.slane %v694_v61, 4 }
 0x11d   : > { %v935_v37 = vpop.xlane.xlu1 %934  ;;  %v942_v46 = vsel %vm609_vm0, %v940_v40, %v931_v32  ;;  %v731_v32 = vsel %vm701_vm9, %v684_v35, -inf  ;;  %v740_v33 = vmax.f32 %v738_v5, %v739_v19  ;;  %v712_v40 = vmax.f32 %v710_v13, %v711_v27 }
 0x11e   : > { %v943_v39 = vsel %vm670_vm6, %v941_v36, %v935_v37  ;;  %v870_v41 = vmax.f32 %v868_v28, %v869_v31  ;;  %v863_v14 = vmax.f32 %v861_v53, %v862_v1  ;;  %v726_v18 = vmax.f32 %v724_v52, %v725_v4 }
 0x11f   : > { %v1635_v42 = vsel %vm945_vm11, %v943_v39, -inf  ;;  %v954_v43 = vsel %vm953_vm5, %v943_v39, -inf  ;;  %v696_v26 = vmax.f32 %v694_v61, %v695_v12  ;;  %v858_v31 = vmax.f32 %v856_v62, %v857_v7 }
 0x120   : > { %v938_v47 = vpop.xlane.xlu0 %937  ;;  %v955_v49 = vrot.slane %v954_v43, 4  ;;  %v871_v57 = vrot.slane %v870_v41, 2  ;;  %v864_v29 = vrot.slane %v863_v14, 2  ;;  %v727_v39 = vrot.slane %v726_v18, 2 }
 0x121   : > { %v944_v50 = vsel %vm670_vm6, %v942_v46, %v938_v47  ;;  %v852_v44 = vmax.f32 %v850_v17, %v851_v30  ;;  %v859_v45 = vrot.slane %v858_v31, 1  ;;  %v875_v35 = vsel %vm853_vm10, %v1621_v25, -inf }
 0x122   : > { %v961_v54 = vsel %vm945_vm11, %v944_v50, -inf  ;;  %v956_v59 = vmax.f32 %v954_v43, %v955_v49  ;;  %v872_v11 = vmax.f32 %v870_v41, %v871_v57  ;;  %v968_v28 = vsel %vm953_vm5, %v944_v50, -inf }
 0x123   : > { %v962_v60 = vrot.slane %v961_v54, 4  ;;  %v969_v36 = vrot.slane %v968_v28, 4  ;;  %v697_v41 = vrot.slane %v696_v26, 2  ;;  %v732_v43 = vrot.slane %v731_v32, 4 }
 0x124   : > { %v957_v2 = vrot.slane %v956_v59, 2  ;;  %v873_v23 = vrot.slane %v872_v11, 1  ;;  %v865_v46 = vmax.f32 %v863_v14, %v864_v29  ;;  %v708_v47 = vmax.f32 %v706_v20, %v707_v34 }
 0x125   : > { %v963_v3 = vmax.f32 %v961_v54, %v962_v60  ;;  %v970_v48 = vmax.f32 %v968_v28, %v969_v36  ;;  %v722_v49 = vrot.slane %v721_v38, 1  ;;  %v728_v50 = vmax.f32 %v726_v18, %v727_v39 }
 0x126   : > { %v958_v8 = vmax.f32 %v956_v59, %v957_v2  ;;  %v874_v37 = vmax.f32 %v872_v11, %v873_v23  ;;  %v741_v51 = vrot.slane %v740_v33, 2  ;;  %v698_v52 = vmax.f32 %v696_v26, %v697_v41 }
 0x127   : > { %v964_v10 = vrot.slane %v963_v3, 2  ;;  %v713_v53 = vrot.slane %v712_v40, 2  ;;  %v733_v54 = vmax.f32 %v731_v32, %v732_v43  ;;  %v876_v55 = vrot.slane %v875_v35, 4 }
 0x128   : > { %v959_v16 = vrot.slane %v958_v8, 1  ;;  %v860_v57 = vmax.f32 %v858_v31, %v859_v45  ;;  %v866_v59 = vrot.slane %v865_v46, 1  ;;  %v971_v60 = vrot.slane %v970_v48, 2 }
 0x129   : > { %v965_v15 = vmax.f32 %v963_v3, %v964_v10  ;;  %v723_v25 = vmax.f32 %v721_v38, %v722_v49  ;;  %v729_v61 = vrot.slane %v728_v50, 1  ;;  %v742_v62 = vmax.f32 %v740_v33, %v741_v51 }
 0x12a   : > { %v960_v21 = vmax.f32 %v958_v8, %v959_v16  ;;  %v714_v63 = vmax.f32 %v712_v40, %v713_v53  ;;  %v877_v1 = vmax.f32 %v875_v35, %v876_v55  ;;  %v867_v2 = vmax.f32 %v865_v46, %v866_v59 }
 0x12b   : > { %v966_v22 = vrot.slane %v965_v15, 1  ;;  %v699_v3 = vrot.slane %v698_v52, 1  ;;  %v734_v4 = vrot.slane %v733_v54, 2  ;;  %v972_v5 = vmax.f32 %v970_v48, %v971_v60 }
 0x12c   : > { %976 = vrot.lane.b32.xlu0 %v960_v21, %s1410_s9  ;;  %v730_v6 = vmax.f32 %v728_v50, %v729_v61  ;;  %v743_v0 = vrot.slane %v742_v62, 1  ;;  %v878_v8 = vrot.slane %v877_v1, 2  ;;  %v715_v11 = vrot.slane %v714_v63, 1 }
 0x12d   : > { %v967_v56 = vmax.f32 %v965_v15, %v966_v22  ;;  %v700_v10 = vmax.f32 %v698_v52, %v699_v3  ;;  %v735_v12 = vmax.f32 %v733_v54, %v734_v4  ;;  %v973_v7 = vrot.slane %v972_v5, 1 }
 0x12e   : > { %v744_v13 = vmax.f32 %v742_v62, %v743_v0  ;;  %v716_v14 = vmax.f32 %v714_v63, %v715_v11  ;;  %v879_v16 = vmax.f32 %v877_v1, %v878_v8  ;;  %v687_v21 = vrot.slane %v1603_v58, 4 }
 0x12f   : > { %980 = vrot.lane.b32.xlu1 %v967_v56, %s1411_s10  ;;  %v736_v15 = vrot.slane %v735_v12, 1  ;;  %v974_v17 = vmax.f32 %v972_v5, %v973_v7  ;;  %v947_v24 = vrot.slane %v1635_v42, 4  ;;  %v839_v26 = vrot.slane %v1611_v9, 4 }
 0x130   : > { %895 = vrot.lane.b32.xlu0 %v874_v37, %s1412_s11  ;;  %v880_v19 = vrot.slane %v879_v16, 1  ;;  %v688_v23 = vmax.f32 %v1603_v58, %v687_v21  ;;  %vm773_vm0 = vcmask 64512   ;;  %vm776_vm6 = vcmask 195584  }
 0x131   : > { %v737_v18 = vmax.f32 %v735_v12, %v736_v15  ;;  %v948_v56 = vmax.f32 %v1635_v42, %v947_v24  ;;  %v840_v30 = vmax.f32 %v1611_v9, %v839_v26  ;;  %vm779_vm5 = vcmask 326656  }
 0x132   : > { %v881_v20 = vmax.f32 %v879_v16, %v880_v19  ;;  %v689_v29 = vrot.slane %v688_v23, 2  ;;  %vm905_vm7 = vcmask 146432   ;;  %vm782_vm8 = vcmask 457728  }
 0x133   : > { %883 = vrot.lane.b32.xlu1 %v852_v44, %s1413_s12  ;;  %v949_v33 = vrot.slane %v948_v56, 2  ;;  %v841_v36 = vrot.slane %v840_v30, 2  ;;  %vm1038_vm9 = vcmask 125952   ;;  %vm1016_vm10 = vcmask 519168  }
 0x134   : > { %750 = vrot.lane.b32.xlu0 %v708_v47, %s1403_s14  ;;  %s1416_s14 = smov 40   ;;  %v690_v34 = vmax.f32 %v688_v23, %v689_v29  ;;  %vm1027_vm11 = vcmask 289792  }
 0x135   : > { %v950_v39 = vmax.f32 %v948_v56, %v949_v33  ;;  %v842_v40 = vmax.f32 %v840_v30, %v841_v36 }
 0x136   : > { %v691_v58 = vrot.slane %v690_v34, 1 }
 0x137   : > { %887 = vrot.lane.b32.xlu1 %v860_v57, %s1414_s15  ;;  %v951_v44 = vrot.slane %v950_v39, 1  ;;  %v843_v46 = vrot.slane %v842_v40, 1 }
 0x138   : > { %758 = vrot.lane.b32.xlu0 %v723_v25, %s1405_s16  ;;  %s1418_s16 = smov 30   ;;  %v692_v45 = vmax.f32 %v690_v34, %v691_v58 }
 0x139   : > { %v952_v9 = vmax.f32 %v950_v39, %v951_v44  ;;  %v844_v48 = vmax.f32 %v842_v40, %v843_v46 }
 0x13b   : > { %891 = vrot.lane.b32.xlu1 %v867_v2, %s1415_s17 }
 0x13c   : > { %762 = vrot.lane.b32.xlu0 %v730_v6, %s1416_s14 }
 0x13f   : > { %746 = vrot.lane.b32.xlu1 %v700_v10, %s1411_s10 }
 0x140   : > { %770 = vrot.lane.b32.xlu0 %v744_v13, %s1417_s18 }
 0x143   : > { %754 = vrot.lane.b32.xlu1 %v716_v14, %s1412_s11 }
 0x144   : > { %984 = vrot.lane.b32.xlu0 %v974_v17, %s1414_s15 }
 0x147   : > { %766 = vrot.lane.b32.xlu1 %v737_v18, %s1402_s13  ;;  %s1671_s13 = sshll.u32 %s1724_s27, 2 }
 0x148   : > { %s470_s21 = scalar_lea.vmem %s1712_s4, %s1671_s13  ;;  %s456_s23 = scalar_lea.vmem %s1710_s2, %s1671_s13 }
 0x149   : > { %v1029_v4 = vld [vmem:[%s470_s21] sm:$0xf]  ;;  %s500_s26 = scalar_lea.vmem %s1716_s8, %s1671_s13  ;;  %s463_s11 = scalar_lea.vmem %s1711_s3, %s1671_s13 }
 0x14a   : > { %v1007_v8 = vld [vmem:[%s456_s23] sm:$0xf]  ;;  %s486_s17 = scalar_lea.vmem %s1714_s6, %s1671_s13 }
 0x14b   : > { %899 = vrot.lane.b32.xlu1 %v881_v20, %s1418_s16  ;;  %v1018_v12 = vld [vmem:[%s463_s11] sm:$0xf]  ;;  %s493_s16 = scalar_lea.vmem %s1715_s7, %s1671_s13 }
 0x19e   : > { %v977_v22 = vpop.permute.xlu0 %976 }
 0x19f   : > { %v987_v51 = vsel %vm673_vm14, %v952_v9, %v977_v22  ;;  %vm784_vm14 = vcmask 516096  }
 0x1a1   : > { %v981_v27 = vpop.permute.xlu1 %980 }
 0x1a2   : > { %v896_v28 = vpop.permute.xlu0 %895  ;;  %v988_v53 = vsel %vm773_vm0, %v987_v51, %v981_v27 }
 0x1a5   : > { %v884_v31 = vpop.permute.xlu1 %883 }
 0x1a6   : > { %v751_v32 = vpop.permute.xlu0 %750  ;;  %v902_v57 = vsel %vm679_vm15, %v844_v48, %v884_v31  ;;  %vm910_vm15 = vcmask 286720  }
 0x1a9   : > { %v888_v37 = vpop.permute.xlu1 %887 }
 0x1aa   : > { %v759_v38 = vpop.permute.xlu0 %758  ;;  %v904_v25 = vsel %vm903_vm1, %v902_v57, %v888_v37 }
 0x1ad   : > { %v892_v41 = vpop.permute.xlu1 %891 }
 0x1ae   : > { %v763_v43 = vpop.permute.xlu0 %762  ;;  %v906_v62 = vsel %vm905_vm7, %v904_v25, %v892_v41 }
 0x1af   : > { %v907_v3 = vsel %vm776_vm6, %v906_v62, %v896_v28 }
 0x1b1   : > { %v747_v35 = vpop.permute.xlu1 %746 }
 0x1b2   : > { %v774_v42 = vsel %vm773_vm0, %v692_v45, %v747_v35  ;;  %v771_v47 = vpop.permute.xlu0 %770 }
 0x1b3   : > { %v775_v50 = vsel %vm565_vm3, %v774_v42, %v751_v32  ;;  %vm1718_vm3 = vcmask 392192  }
 0x1b5   : > { %v755_v49 = vpop.permute.xlu1 %754 }
 0x1b6   : > { %v777_v52 = vsel %vm776_vm6, %v775_v50, %v755_v49  ;;  %v985_v55 = vpop.permute.xlu0 %984 }
 0x1b7   : > { %v778_v54 = vsel %vm567_vm4, %v777_v52, %v759_v38  ;;  %v989_v59 = vsel %vm903_vm1, %v988_v53, %v985_v55  ;;  %vm908_vm4 = vcmask 244736  }
 0x1b8   : > { %v780_v60 = vsel %vm779_vm5, %v778_v54, %v763_v43  ;;  %991 = vst.msk [vmem:[#allocation5] sm:$0x1] %vm990_vm2, %v989_v59 }
 0x1b9   : > { %v767_v61 = vpop.permute.xlu1 %766 }
 0x1ba   : > { %v781_v63 = vsel %vm1718_vm3, %v780_v60, %v767_v61 }
 0x1bb   : > { %v783_v1 = vsel %vm782_vm8, %v781_v63, %v771_v47 }
 0x1bc   : > { %785 = vst.msk [vmem:[#allocation3] sm:$0x1] %vm784_vm14, %v783_v1 }
 0x1bd   : > { %v900_v2 = vpop.permute.xlu1 %899 }
 0x1be   : > { %v909_v5 = vsel %vm908_vm4, %v907_v3, %v900_v2 }
 0x1bf   : > { %911 = vst.msk [vmem:[#allocation4] sm:$0x1] %vm910_vm15, %v909_v5  ;;  %v1331_v6 = vld [vmem:[#allocation5] ss:$0 sm:$0xff] }
 0x1c0   : > { %v1037_v0 = vadd.f32 %v1331_v6, %v1029_v4 }
 0x1c2   : > { %1039 = vst.msk [vmem:[%s500_s26] sm:$0xf] %vm1038_vm9, %v1037_v0 }
 0x1c3   : > { %v1329_v10 = vld [vmem:[#allocation3] ss:$0 sm:$0xff] }
 0x1c4   : > { %v1015_v11 = vadd.f32 %v1329_v10, %v1007_v8 }
 0x1c6   : > { %1017 = vst.msk [vmem:[%s486_s17] sm:$0xf] %vm1016_vm10, %v1015_v11  ;;  %v1330_v13 = vld [vmem:[#allocation4] ss:$0 sm:$0xff] }
 0x1c7   : > { %v1026_v7 = vadd.f32 %v1330_v13, %v1018_v12 }
 0x1c9   : > { %1028 = vst.msk [vmem:[%s493_s16] sm:$0xf] %vm1027_vm11, %v1026_v7 }
 0x1ca PF: > { %s19_s29 = sadd.s32 1, %s1400_s29   ;;  %s1719_s27 = smov %s1396_s28 }
 0x1cb   : > { %p16_p5 = scmp.ge.s32.totalorder %s19_s29, 4   ;;  %s1720_s28 = smov %s1722_s30 }
 0x1cd   :  { %18 = sbr.rel (!%p16_p5) target bundleno = 2 (0x2), region = 122 }

</bundles_post_ra>
